<compile_context>
chip_gen: v7x
topology: tpu7x:2x2x1
jax: 0.10.0
libtpu: 0.0.40
codegen_flags: <defaults>
</compile_context>

<pallas_src>
import functools

import jax
import jax.numpy as jnp
from jax import lax
from jax.experimental import pallas as pl
from jax.experimental.pallas import tpu as pltpu

_LANES = 128
_PRED_BLOCK_BYTES = 8 * 1024 * 1024    # per pred block (double-buffered -> ~16 MiB)
_MAX_TILE_ROWS = 8192
_VMEM_LIMIT_BYTES = 32 * 1024 * 1024   # explicit scoped-VMEM limit, safe on v5e..v7x


def _bce_boundary_kernel(pred_ref, tgt_ref, out_ref, *,
                         tile_rows, s_valid, need_mask, fold):
    # pred_ref: (1, C, tile_rows, 128)  native dtype (f32 / bf16)
    # tgt_ref : (1, tile_rows, 128)     bf16 boundary target in {0, 1}
    # out_ref : (1, 1, fold_rows, 128)  f32 per-(b, s) partial sums
    p = pred_ref[0].astype(jnp.float32)            # (C, R, 128)
    t = tgt_ref[0].astype(jnp.float32)             # (R, 128)

    # sigmoid via a single tanh (1 EUP op) instead of exp + exact reciprocal.
    x = 0.5 * jnp.tanh(0.5 * p) + 0.5              # (C, R, 128)

    # BCEWithLogits(x, t) with x in (0,1):  x*(1-t) + log(1 + exp(-x)).
    # Sum over channels first (pure VPU adds), apply the shared (1-t) once.
    sx = jnp.sum(x, axis=0)                                    # (R, 128)
    sl = jnp.sum(jnp.log(1.0 + jnp.exp(-x)), axis=0)           # (R, 128)
    psum = sx * (1.0 - t) + sl                                 # (R, 128)

    if need_mask:
        # Mask rows / lanes beyond the true spatial size (partial last grid
        # block reads unspecified data; padded tail must not contribute).
        s = pl.program_id(1)
        row = lax.broadcasted_iota(jnp.int32, (tile_rows, _LANES), 0)
        lane = lax.broadcasted_iota(jnp.int32, (tile_rows, _LANES), 1)
        elem = (s * tile_rows + row) * _LANES + lane
        psum = jnp.where(elem < s_valid, psum, 0.0)

    if fold:
        # Fold to an (8, 128) lane-dense partial sum (tile-aligned reshape,
        # pure VPU adds — no cross-lane reduction in the kernel).
        psum = jnp.sum(psum.reshape(tile_rows // 8, 8, _LANES), axis=0)

    out_ref[0, 0] = psum


def hardnet_dfus_boundary_loss(pred, gt):
    """pred: [B, C, H, W] float (f32 or bf16), gt: [B, 1, H, W] float."""
    B, C, H, W = pred.shape
    assert gt.shape == (B, 1, H, W)
    S = H * W
    n_elems = B * C * S

    # ---- glue (plain XLA): 3x3 Laplacian conv (padding=1) + threshold ------
    # constant filter [[-1,-1,-1],[-1,8,-1],[-1,-1,-1]] from __init__
    g = gt.reshape(B, H, W).astype(jnp.float32)
    gp = jnp.pad(g, ((0, 0), (1, 1), (1, 1)))
    conv = 8.0 * g
    for dy in range(3):
        for dx in range(3):
            if dy == 1 and dx == 1:
                continue
            conv = conv - gp[:, dy:dy + H, dx:dx + W]
    tgt = conv > 0.1                                  # [B, H, W] bool

    # ---- lane-dense (rows, 128) layout; no pred copy when S % 128 == 0 -----
    s_pad = -(-S // _LANES) * _LANES
    rows = s_pad // _LANES

    pred_flat = pred.reshape(B, C, S)                 # free reshape
    tgt_flat = tgt.reshape(B, S)
    if s_pad != S:
        # TODO(synk): rare ragged-tail path (H*W not a multiple of 128) still
        # pads pred (one extra HBM copy); padded elements are masked in-kernel.
        pred_flat = jnp.pad(pred_flat, ((0, 0), (0, 0), (0, s_pad - S)))
        tgt_flat = jnp.pad(tgt_flat, ((0, 0), (0, s_pad - S)))
    pred_t = pred_flat.reshape(B, C, rows, _LANES)               # free reshape
    tgt_t = tgt_flat.reshape(B, rows, _LANES).astype(jnp.bfloat16)

    # ---- tile sizing from an explicit VMEM budget ---------------------------
    itemsize = jnp.dtype(pred.dtype).itemsize
    row_bytes = C * _LANES * itemsize
    cap = max(16, min(_MAX_TILE_ROWS, (_PRED_BLOCK_BYTES // row_bytes) // 16 * 16))
    if rows <= cap:
        tile_rows, n_s = rows, 1          # full rows in one block (any value OK)
    else:
        tile_rows = cap                   # multiple of 16: f32 & bf16 friendly
        n_s = pl.cdiv(rows, tile_rows)    # partial last block is masked
    # v7x: guarantee >= 2 parallel grid steps so both TensorCores get work.
    if B == 1 and n_s == 1 and rows >= 32:
        tile_rows = ((rows + 1) // 2 + 15) // 16 * 16
        n_s = pl.cdiv(rows, tile_rows)

    need_mask = (n_s * tile_rows * _LANES) != S
    fold = (tile_rows % 8 == 0)
    fold_rows = 8 if fold else tile_rows

    kernel = functools.partial(_bce_boundary_kernel, tile_rows=tile_rows,
                               s_valid=S, need_mask=need_mask, fold=fold)

    partials = pl.pallas_call(
        kernel,
        out_shape=jax.ShapeDtypeStruct((B, n_s, fold_rows, _LANES), jnp.float32),
        grid=(B, n_s),
        in_specs=[
            # pred block: all channels of one (b, s) spatial tile
            pl.BlockSpec((1, C, tile_rows, _LANES), lambda b, s: (b, 0, s, 0)),
            # boundary target tile: shared across channels, one DMA per step
            pl.BlockSpec((1, tile_rows, _LANES), lambda b, s: (b, s, 0)),
        ],
        out_specs=pl.BlockSpec((1, 1, fold_rows, _LANES),
                               lambda b, s: (b, s, 0, 0)),
        compiler_params=pltpu.CompilerParams(
            dimension_semantics=("parallel", "parallel"),
            vmem_limit_bytes=_VMEM_LIMIT_BYTES),
    )(pred_t, tgt_t)

    return jnp.sum(partials) / float(n_elems)


def _reference_loss(pred, gt):
    """Pure-JAX reference of the PyTorch module (for a sanity check)."""
    B, C, H, W = pred.shape
    lap = jnp.array([[-1., -1., -1.], [-1., 8., -1.], [-1., -1., -1.]],
                    dtype=jnp.float32)
    g = gt[:, 0].astype(jnp.float32)
    gp = jnp.pad(g, ((0, 0), (1, 1), (1, 1)))
    conv = sum(lap[dy, dx] * gp[:, dy:dy + H, dx:dx + W]
               for dy in range(3) for dx in range(3))
    t = jnp.broadcast_to((conv > 0.1).astype(jnp.float32)[:, None], pred.shape)
    x = jax.nn.sigmoid(pred.astype(jnp.float32))
    loss = jnp.maximum(x, 0.0) - x * t + jnp.log1p(jnp.exp(-jnp.abs(x)))
    return jnp.mean(loss)


if __name__ == "__main__":
    key = jax.random.PRNGKey(0)
    k1, k2 = jax.random.split(key)
    B, C, H, W = 2, 4, 16, 16
    pred = jax.random.normal(k1, (B, C, H, W), dtype=jnp.float32)
    gt = (jax.random.uniform(k2, (B, 1, H, W)) > 0.5).astype(jnp.float32)

    loss = hardnet_dfus_boundary_loss(pred, gt)
    jax.block_until_ready(loss)

    ref = _reference_loss(pred, gt)
    assert jnp.abs(loss - ref) < 1e-4, (float(loss), float(ref))
    print("KERNEL_OK")
</pallas_src>

<mosaic_0001>
module attributes {stable_mosaic.version = 11 : i64} {
  func.func @_bce_boundary_kernel(%arg0: i32, %arg1: i32, %arg2: memref<1x4x2x128xf32, #tpu.memory_space<vmem>>, %arg3: memref<1x2x128xbf16, #tpu.memory_space<vmem>>, %arg4: memref<1x1x2x128xf32, #tpu.memory_space<vmem>>) attributes {dimension_semantics = [#tpu.dimension_semantics<parallel>, #tpu.dimension_semantics<parallel>], iteration_bounds = array<i64: 2, 1>, scalar_prefetch = 0 : i64, scratch_operands = 0 : i64, tpu.core_type = #tpu.core_type<tc>, window_params = [{transform_indices = @transform_0, window_bounds = array<i64: 1, 4, 2, 128>}, {transform_indices = @transform_1, window_bounds = array<i64: 1, 2, 128>}, {transform_indices = @transform_2, window_bounds = array<i64: 1, 1, 2, 128>}]} {
    %c0 = arith.constant 0 : index
    %c0_0 = arith.constant 0 : index
    %c0_1 = arith.constant 0 : index
    %c0_2 = arith.constant 0 : index
    %0 = vector.load %arg2[%c0, %c0_0, %c0_1, %c0_2] : memref<1x4x2x128xf32, #tpu.memory_space<vmem>>, vector<1x4x2x128xf32>
    %1 = vector.shape_cast %0 : vector<1x4x2x128xf32> to vector<4x2x128xf32>
    %c0_3 = arith.constant 0 : index
    %c0_4 = arith.constant 0 : index
    %c0_5 = arith.constant 0 : index
    %2 = vector.load %arg3[%c0_3, %c0_4, %c0_5] : memref<1x2x128xbf16, #tpu.memory_space<vmem>>, vector<1x2x128xbf16>
    %3 = vector.shape_cast %2 : vector<1x2x128xbf16> to vector<2x128xbf16>
    %4 = arith.extf %3 : vector<2x128xbf16> to vector<2x128xf32>
    %cst = arith.constant 5.000000e-01 : f32
    %5 = vector.broadcast %cst : f32 to vector<4x2x128xf32>
    %6 = arith.mulf %5, %1 : vector<4x2x128xf32>
    %7 = math.tanh %6 : vector<4x2x128xf32>
    %cst_6 = arith.constant 5.000000e-01 : f32
    %8 = vector.broadcast %cst_6 : f32 to vector<4x2x128xf32>
    %9 = arith.mulf %8, %7 : vector<4x2x128xf32>
    %cst_7 = arith.constant 5.000000e-01 : f32
    %10 = vector.broadcast %cst_7 : f32 to vector<4x2x128xf32>
    %11 = arith.addf %9, %10 : vector<4x2x128xf32>
    %cst_8 = arith.constant dense<0.000000e+00> : vector<2x128xf32>
    %12 = vector.multi_reduction <add>, %11, %cst_8 [0] : vector<4x2x128xf32> to vector<2x128xf32>
    %cst_9 = arith.constant 0.000000e+00 : f32
    %13 = vector.broadcast %cst_9 : f32 to vector<4x2x128xf32>
    %14 = arith.subf %13, %11 : vector<4x2x128xf32>
    %15 = math.exp %14 : vector<4x2x128xf32>
    %cst_10 = arith.constant 1.000000e+00 : f32
    %16 = vector.broadcast %cst_10 : f32 to vector<4x2x128xf32>
    %17 = arith.addf %16, %15 : vector<4x2x128xf32>
    %18 = math.log %17 : vector<4x2x128xf32>
    %cst_11 = arith.constant dense<0.000000e+00> : vector<2x128xf32>
    %19 = vector.multi_reduction <add>, %18, %cst_11 [0] : vector<4x2x128xf32> to vector<2x128xf32>
    %cst_12 = arith.constant 1.000000e+00 : f32
    %20 = vector.broadcast %cst_12 : f32 to vector<2x128xf32>
    %21 = arith.subf %20, %4 : vector<2x128xf32>
    %22 = arith.mulf %12, %21 : vector<2x128xf32>
    %23 = arith.addf %22, %19 : vector<2x128xf32>
    %c0_13 = arith.constant 0 : index
    %c0_14 = arith.constant 0 : index
    %c0_15 = arith.constant 0 : index
    %c0_16 = arith.constant 0 : index
    %24 = vector.load %arg4[%c0_13, %c0_14, %c0_15, %c0_16] : memref<1x1x2x128xf32, #tpu.memory_space<vmem>>, vector<1x1x2x128xf32>
    %25 = vector.shape_cast %24 : vector<1x1x2x128xf32> to vector<2x128xf32>
    %26 = vector.shape_cast %23 : vector<2x128xf32> to vector<1x1x2x128xf32>
    tpu.vector_store %arg4[%c0_13, %c0_14, %c0_15, %c0_16], %26 {strides = array<i32>} : memref<1x1x2x128xf32, #tpu.memory_space<vmem>>, vector<1x1x2x128xf32>,
    return
  }
  func.func @transform_0(%arg0: i32, %arg1: i32) -> (i32, i32, i32, i32) {
    %c0_i32 = arith.constant 0 : i32
    %c0_i32_0 = arith.constant 0 : i32
    %c0_i32_1 = arith.constant 0 : i32
    return %arg0, %c0_i32, %arg1, %c0_i32_0 : i32, i32, i32, i32
  }
  func.func @transform_1(%arg0: i32, %arg1: i32) -> (i32, i32, i32) {
    %c0_i32 = arith.constant 0 : i32
    %c0_i32_0 = arith.constant 0 : i32
    return %arg0, %arg1, %c0_i32 : i32, i32, i32
  }
  func.func @transform_2(%arg0: i32, %arg1: i32) -> (i32, i32, i32, i32) {
    %c0_i32 = arith.constant 0 : i32
    %c0_i32_0 = arith.constant 0 : i32
    %c0_i32_1 = arith.constant 0 : i32
    return %arg0, %arg1, %c0_i32, %c0_i32_0 : i32, i32, i32, i32
  }
}

</mosaic_0001>

<bundles_post_ra>
// kernel: tpu_custom_call.1
= control target key start
LH: loop header
LB: loop body
LE: loop exit
PB: predicated region body
PF: predicated region fallthrough
CT: control target
= control target key end

     0   :  { %7 = vsyncpa [#allocation3], 0  ;;  %s800_s0 = inlined_call_operand.hbm [shape: f32[2,4,2,128], index: 0, kind: input, shape index: {}]   ;;  %s801_s1 = inlined_call_operand.vmem [shape: bf16[2,2,128], index: 1, kind: input, shape index: {}]   ;;  %s802_s2 = inlined_call_operand.hbm [shape: f32[2,1,2,128], index: 2, kind: output, shape index: {}]  }
   0x1   :  { %9 = vsyncpa [#allocation3 + $0x1], 0 }
   0x2   :  { %10 = vsyncpa [#allocation4], 0 }
   0x3   :  { %12 = vsyncpa [#allocation4 + $0x1], 0  ;;  %s613_s9 = smov 0   ;;  %s615_s10 = smov 0  }
   0x4   :  { %s617_s11 = smov 0   ;;  %s619_s12 = smov 0  }
   0x5   :  { %s621_s13 = smov 0   ;;  %s623_s14 = smov 0  }
   0x6 LB: > { %s377_s15 = sadd.s32 4294967295, %s592_s14   ;;  %s378_s16 = sadd.s32 4294967294, %s592_s14   ;;  %s592_s14 = sphi %s623_s14, %s18_s14   ;;  %s588_s13 = sphi %s621_s13, %s817_s13   ;;  %s584_s12 = sphi %s619_s12, %s816_s12   ;;  %s580_s11 = sphi %s617_s11, %s815_s11   ;;  %s576_s10 = sphi %s615_s10, %s814_s10   ;;  %s572_s9 = sphi %s613_s9, %s813_s9  }
   0x7   : > { %s30_s17 = sadd.s32 1, %s588_s13  ;;  %s39_s18 = sadd.s32 1, %s580_s11 }
   0x8   : > { %p32_p0 = scmp.ge.s32.totalorder %s30_s17, 2  ;;  %p46_p1 = scmp.ne.s32.totalorder %s580_s11, %s576_s10 }
   0x9   : > { %p47_p2 = scmp.eq.s32.totalorder %s592_s14, 0  ;;  %p52_p3 = scmp.ne.s32.totalorder %s576_s10, %s572_s9 }
   0xa   : > { %s819_s17 = smov (%p32_p0, %s30_s17), 0  ;;  %p53_p5 = scmp.eq.s32.totalorder %s377_s15, 0 }
   0xb   : > { %p654_p4 = por %p47_p2, %p46_p1  ;;  %s34_s20 = ssub.s32 %s588_s13, %s819_s17 }
   0xc   : > { %p106_p6 = scmp.eq.s32.totalorder %s377_s15, 1  ;;  %p37_p7 = scmp.eq.s32.totalorder %s34_s20, 0 }
   0xd   : > { %p660_p8 = por %p53_p5, %p52_p3  ;;  %p112_p10 = scmp.eq.s32.totalorder %s378_s16, 1 }
   0xe   : > { %p664_p9 = por %p106_p6, %p46_p1  ;;  %p404_p13 = scmp.lt.s32.totalorder %s592_s14, 2 }
   0xf   : > { %s669_s23 = scalar_select %p37_p7, %s580_s11, %s39_s18  }
  0x10   : > { %s806_s22 = scalar_select %p664_p9, 1, 0 }
  0x11   : > { %p671_p11 = por %p112_p10, %p52_p3  ;;  %s132_s25 = sand.u32 1, %s580_s11  }
  0x12   : > { %s381_s26 = sshll.u32 %s132_s25, 3  ;;  %s391_s27 = sshll.u32 %s588_s13, 7 }
  0x13   : > { %s807_s24 = scalar_select %p671_p11, 1, 0 }
  0x14   : > { %s682_s30 = scalar_lea.hbm %s800_s0, %s391_s27  ;;  %s136_s3 = scalar_lea.vmem [#allocation2], %s381_s26 }
  0x15   : > { %s144_s4 = sshll.u32 %s136_s3, 4  ;;  %p688_p0 = pnand %p404_p13, %p654_p4  ;;  %s684_s4 = int_to_ptr.vmem [resolvable:$true] %s144_s4 }
  0x16   : > { %s693_s6 = scalar_lea.sflag [#allocation3], %s132_s25  ;;  %s480_s7 = scalar_lea.hbm %s682_s30, 128 }
  0x17   : > { %p481_p2 = scmp.ne.s32.totalorder %s682_s30, %s480_s7  ;;  %p482_p3 = pneg %p688_p0 }
  0x18   : > { %s485_s16 = scalar_lea.hbm %s800_s0, 256  ;;  %p486_p4 = scmp.lt.u32.totalorder %s682_s30, %s800_s0 }
  0x19   : > { %p483_p5 = pnand %p482_p3, %p481_p2  ;;  %p487_p7 = scmp.lt.u32.totalorder %s485_s16, %s480_s7 }
  0x1a   : > { %p489_p13 = scmp.lt.u32.totalorder %s480_s7, %s682_s30 }
  0x1b   : > { %p484_p6 = pneg %p483_p5  ;;  %p488_p10 = por %p487_p7, %p486_p4 }
  0x1d   : > { %p490_p12 = por %p489_p13, %p488_p10 }
  0x1f   : > { %p491_p1 = pnand %p490_p12, %p484_p6 }
  0x21   : > { %494 = shalt.err (!%p491_p1)
}
  0x22   : > { %s495_s20 = scalar_lea.vmem %s684_s4, 128  ;;  %s594_s25 = smov [#allocation2]  }
  0x23   : > { %p496_p2 = scmp.ne.s32.totalorder %s684_s4, %s495_s20  ;;  %s500_s26 = sshll.u32 %s594_s25, 4  ;;  %s501_s26 = int_to_ptr.vmem [resolvable:$false] %s500_s26 }
  0x24   : > { %s502_s27 = scalar_lea.vmem %s501_s26, 256  ;;  %p503_p9 = scmp.lt.s32.totalorder %s684_s4, %s501_s26 }
  0x25   : > { %p498_p5 = pnand %p496_p2, %p482_p3  ;;  %p504_p4 = scmp.lt.s32.totalorder %s502_s27, %s495_s20 }
  0x27   : > { %p499_p11 = pneg %p498_p5  ;;  %p505_p7 = por %p504_p4, %p503_p9 }
  0x29   : > { %p506_p10 = pnand %p505_p7, %p499_p11 }
  0x2b   : > { %509 = shalt.err (!%p506_p10)
}
  0x2c   : > { %s595_s28 = smov 32   ;;  %s596_s29 = smov 2  }
  0x2d   : > { %399 = dma.hbm_to_vmem [thread:$0]  (!%p688_p0), %s682_s30, 128, %s684_s4, %s693_s6, %s595_s28, %s595_s28, %s596_s29  }
  0x2e   : > { %p161_p12 = scmp.lt.s32.totalorder %s592_s14, 3  ;;  %p809_p1 = scmp.ge.s32.totalorder %s592_s14, 1 }
  0x30   : > { %p162_p3 = pnand %p809_p1, %p161_p12 }
  0x31   : > { %s725_s3 = sand.u32 (!%p162_p3), 1, %s576_s10  }
  0x32   : > { %165 = sbr.rel (%p162_p3) target bundleno = 130 (0x82), region = 28  ;;  %s385_s7 = sshll.u32 (!%p162_p3), %s725_s3, 3 }
  0x33   : > { %s168_s8 = scalar_lea.sflag (!%p162_p3), [#allocation3], %s725_s3  ;;  %s171_s15 = scalar_lea.vmem (!%p162_p3), [#allocation2], %s385_s7 }
  0x39   : > { %563 = dma.done.wait (%p660_p8), %s168_s8, 128  }
  0x3a   : > { %565 = vsyncadd (%p660_p8), %s168_s8, 4294967168  ;;  %v204_v0 = vld [vmem:[%s171_s15] sm:$0x3]  ;;  %v205_v1 = vld [vmem:[%s171_s15 + $0x2] sm:$0x3]  ;;  %p198_p8 = scmp.lt.s32.totalorder %s584_s12, 1 }
  0x3b   : > { %v206_v2 = vld [vmem:[%s171_s15 + $0x4] sm:$0x3]  ;;  %v207_v3 = vld [vmem:[%s171_s15 + $0x6] sm:$0x3]  ;;  %v210_v4 = vmul.f32 0.5, %v204_v0  ;;  %v211_v5 = vmul.f32 0.5, %v205_v1 }
  0x3c   : > { %v212_v6 = vmul.f32 0.5, %v206_v2  ;;  %v213_v7 = vmul.f32 0.5, %v207_v3  ;;  %s199_s21 = scalar_select %p198_p8, %s584_s12, 1  ;;  %vm226_vm0 = vcmask 1041408  }
  0x3d   : > { %456 = vtanh.f32 %v210_v4  ;;  %s386_s6 = sshll.u32 %s725_s3, 1  ;;  %s388_s19 = sshll.u32 %s584_s12, 5 }
  0x3e   : > { %458 = vtanh.f32 %v211_v5  ;;  %s203_s5 = scalar_lea.vmem %s801_s1, %s199_s21  ;;  %s197_s16 = scalar_lea.vmem [#allocation5], %s386_s6 }
  0x3f   : > { %460 = vtanh.f32 %v212_v6  ;;  %v208_v39 = vld [vmem:[%s203_s5] sm:$0x1]  ;;  %s284_s18 = sshll.u32 %s197_s16, 4  ;;  %s753_s26 = scalar_lea.hbm %s802_s2, %s388_s19  ;;  %s748_s18 = int_to_ptr.vmem [resolvable:$true] %s284_s18 }
  0x40   : > { %462 = vtanh.f32 %v213_v7  ;;  %v209_v41 = vunpack.c.l.bf16 %v208_v39  ;;  %s270_s27 = scalar_lea.sflag [#allocation4], %s725_s3  ;;  %s510_s28 = scalar_lea.vmem %s748_s18, 32 }
  0x41   : > { %p511_p9 = scmp.ne.s32.totalorder %s748_s18, %s510_s28  ;;  %p810_p11 = scmp.ne.s32.totalorder %s806_s22, 0 }
  0x42   : > { %v265_v53 = vsub.f32 1.0, %v209_v41  ;;  %s597_s12 = smov [#allocation5]  }
  0x43   : > { %p512_p0 = pnand %p511_p9, %p810_p11  ;;  %s514_s29 = sshll.u32 %s597_s12, 4  ;;  %s515_s29 = int_to_ptr.vmem [resolvable:$false] %s514_s29 }
  0x44   : > { %s516_s7 = scalar_lea.vmem %s515_s29, 64  ;;  %p517_p13 = scmp.lt.s32.totalorder %s748_s18, %s515_s29 }
  0x45   : > { %p513_p6 = pneg %p512_p0  ;;  %p518_p2 = scmp.lt.s32.totalorder %s516_s7, %s510_s28 }
  0x47   : > { %v457_v8 = vpop.eup %456  ;;  %p519_p5 = por %p518_p2, %p517_p13 }
  0x48   : > { %v459_v9 = vpop.eup %458  ;;  %v218_v10 = vmul.f32 0.5, %v457_v8 }
  0x49   : > { %v461_v11 = vpop.eup %460  ;;  %v219_v12 = vmul.f32 0.5, %v459_v9  ;;  %p520_p4 = pnand %p519_p5, %p513_p6 }
  0x4a   : > { %v463_v13 = vpop.eup %462  ;;  %v220_v14 = vmul.f32 0.5, %v461_v11  ;;  %v222_v15 = vadd.f32 0.5, %v218_v10 }
  0x4b   : > { %v221_v16 = vmul.f32 0.5, %v463_v13  ;;  %v223_v17 = vadd.f32 0.5, %v219_v12 }
  0x4c   : > { %v224_v18 = vadd.f32 0.5, %v220_v14  ;;  %v234_v19 = vsub.f32 0.0, %v222_v15  ;;  %v227_v36 = vsel %vm226_vm0, %v222_v15, 0.0 }
  0x4d   : > { %v225_v20 = vadd.f32 0.5, %v221_v16  ;;  %v235_v21 = vsub.f32 0.0, %v223_v17  ;;  %v228_v37 = vsel %vm226_vm0, %v223_v17, 0.0 }
  0x4e   : > { %v236_v22 = vsub.f32 0.0, %v224_v18  ;;  %v238_v23 = vmul.f32 1.442695, %v234_v19  ;;  %v229_v38 = vadd.f32 %v228_v37, %v227_v36  ;;  %v230_v40 = vsel %vm226_vm0, %v224_v18, 0.0 }
  0x4f   : > { %v237_v24 = vsub.f32 0.0, %v225_v20  ;;  %v240_v25 = vmul.f32 1.442695, %v235_v21  ;;  %v232_v44 = vsel %vm226_vm0, %v225_v20, 0.0 }
  0x50   : > { %464 = vpow2.f32 %v238_v23  ;;  %v242_v26 = vmul.f32 1.442695, %v236_v22  ;;  %v231_v42 = vadd.f32 %v230_v40, %v229_v38 }
  0x51   : > { %466 = vpow2.f32 %v240_v25  ;;  %v244_v27 = vmul.f32 1.442695, %v237_v24 }
  0x52   : > { %468 = vpow2.f32 %v242_v26  ;;  %v233_v50 = vadd.f32 %v232_v44, %v231_v42 }
  0x53   : > { %470 = vpow2.f32 %v244_v27 }
  0x54   : > { %v266_v60 = vmul.f32 %v265_v53, %v233_v50 }
  0x5a   : > { %v465_v28 = vpop.eup %464 }
  0x5b   : > { %v467_v29 = vpop.eup %466  ;;  %v246_v30 = vadd.f32 1.0, %v465_v28 }
  0x5c   : > { %v469_v31 = vpop.eup %468  ;;  %v247_v32 = vadd.f32 1.0, %v467_v29 }
  0x5d   : > { %v471_v33 = vpop.eup %470  ;;  %v248_v34 = vadd.f32 1.0, %v469_v31  ;;  %472 = vlog2.f32 %v246_v30 }
  0x5e   : > { %v249_v35 = vadd.f32 1.0, %v471_v33  ;;  %474 = vlog2.f32 %v247_v32 }
  0x5f   : > { %476 = vlog2.f32 %v248_v34 }
  0x60   : > { %478 = vlog2.f32 %v249_v35 }
  0x67   : > { %v473_v43 = vpop.eup %472 }
  0x68   : > { %v475_v45 = vpop.eup %474  ;;  %v251_v46 = vmul.f32 0.6931472, %v473_v43 }
  0x69   : > { %v477_v47 = vpop.eup %476  ;;  %v253_v48 = vmul.f32 0.6931472, %v475_v45 }
  0x6a   : > { %v479_v49 = vpop.eup %478  ;;  %v255_v51 = vmul.f32 0.6931472, %v477_v47  ;;  %v258_v52 = vsel %vm226_vm0, %v251_v46, 0.0 }
  0x6b   : > { %v257_v54 = vmul.f32 0.6931472, %v479_v49  ;;  %v259_v55 = vsel %vm226_vm0, %v253_v48, 0.0 }
  0x6c   : > { %v260_v56 = vadd.f32 %v259_v55, %v258_v52  ;;  %v261_v57 = vsel %vm226_vm0, %v255_v51, 0.0 }
  0x6d   : > { %v263_v58 = vsel %vm226_vm0, %v257_v54, 0.0 }
  0x6e   : > { %v262_v59 = vadd.f32 %v261_v57, %v260_v56 }
  0x70   : > { %v264_v61 = vadd.f32 %v263_v58, %v262_v59 }
  0x72   : > { %v267_v62 = vadd.f32 %v266_v60, %v264_v61 }
  0x74   : > { %268 = vst [vmem:[%s197_s16] sm:$0x3] %v267_v62 }
  0x75   : > { %523 = shalt.err (!%p520_p4)
}
  0x76   : > { %s524_s3 = scalar_lea.hbm %s753_s26, 32  ;;  %s528_s21 = scalar_lea.hbm %s802_s2, 64 }
  0x77   : > { %p525_p7 = scmp.ne.s32.totalorder %s753_s26, %s524_s3  ;;  %p529_p1 = scmp.lt.u32.totalorder %s753_s26, %s802_s2 }
  0x78   : > { %p530_p3 = scmp.lt.u32.totalorder %s528_s21, %s524_s3  ;;  %p532_p9 = scmp.lt.u32.totalorder %s524_s3, %s753_s26 }
  0x79   : > { %p526_p10 = pnand %p525_p7, %p810_p11 }
  0x7a   : > { %p531_p8 = por %p530_p3, %p529_p1 }
  0x7b   : > { %p527_p12 = pneg %p526_p10 }
  0x7c   : > { %p533_p0 = por %p532_p9, %p531_p8 }
  0x7e   : > { %p534_p6 = pnand %p533_p0, %p527_p12 }
  0x80   : > { %537 = shalt.err (!%p534_p6)
}
  0x81   : > { %394 = dma.vmem_to_hbm [thread:$0]  (%p810_p11), %s748_s18, 32, %s753_s26, %s270_s27  }
  0x82 PF: > { %s296_s5 = sand.u32 1, %s572_s9   ;;  %p811_p13 = scmp.ne.s32.totalorder %s807_s24, 0 }
  0x83   : > { %p812_p2 = scmp.ge.s32.totalorder %s592_s14, 2  ;;  %s297_s6 = scalar_lea.sflag [#allocation4], %s296_s5 }
  0x85   : > { %p401_p5 = pnand %p812_p2, %p811_p13 }
  0x87   : > { %567 = dma.done.wait (!%p401_p5), %s297_s6, 32  }
  0x88   : > { %569 = vsyncadd (!%p401_p5), %s297_s6, 4294967264  ;;  %s18_s14 = sadd.s32 1, %s592_s14   ;;  %s813_s9 = smov %s576_s10 }
  0x89   : > { %p15_p4 = scmp.ge.s32.totalorder %s18_s14, 4   ;;  %s814_s10 = smov %s580_s11 }
  0x8a   : > { %s815_s11 = smov %s669_s23  ;;  %s816_s12 = smov %s588_s13 }
  0x8b   : > { %s817_s13 = smov %s819_s17  ;;  %17 = sbr.rel (!%p15_p4) target bundleno = 6 (0x6), region = 76 }
  0x92   :  { %302 = vsyncpa [#allocation3], 1 }
  0x93   :  { %304 = vsyncpa [#allocation3 + $0x1], 1 }
  0x94   :  { %305 = vsyncpa [#allocation4], 1 }
  0x95   :  { %307 = vsyncpa [#allocation4 + $0x1], 1 }

</bundles_post_ra>
